<compile_context>
chip_gen: v7x
topology: tpu7x:2x2x1
jax: 0.10.0
libtpu: 0.0.40
codegen_flags: <defaults>
</compile_context>

<pallas_src>
import jax
import jax.numpy as jnp
import numpy as np
from jax import lax
from jax.experimental import pallas as pl
from jax.experimental.pallas import tpu as pltpu


def _round_up(x, m):
    return ((x + m - 1) // m) * m


# ----------------------------- Pallas kernel ------------------------------ #

def wop_kernel(
    wenc_n_ref,   # [TB, mLnP, hP]   bf16  NL-token encodings (zero padded)
    hs_ob_ref,    # [TB, mLwP, hP]   bf16  gathered/padded header encodings
    mask_ref,     # [TB, 1,   mLnP]  f32   additive mask: 0 valid / -1e10 pad
    wstk_ref,     # [3*hP, hP]       bf16  [W_att ; A ; B] stacked
    b1_ref,       # [1, hP]          f32   fused bias: b_c@W1c^T + b_hs@W1h^T + b1
    w2_ref,       # [hP, outP]       bf16  W2^T zero-padded to 128 lanes
    b2_ref,       # [1, outP]        f32
    out_ref,      # [TB, mLwP, outP] bf16
):
    tb, mlnp, hp = wenc_n_ref.shape
    mlwp = hs_ob_ref.shape[1]

    wenc_n = wenc_n_ref[...]
    hs_ob = hs_ob_ref[...]
    hs_flat = hs_ob.reshape(tb * mlwp, hp)

    w_att = wstk_ref[0:hp, :]        # [hP, hP]    W_att (un-transposed)
    w_ab = wstk_ref[hp:3 * hp, :]    # [2*hP, hP]  [A ; B]

    # q = hs_ob @ W_att: project the *small* (mL_w) side.  Identical math to
    # <W_att(wenc_n)[b,n], hs_ob[b,w]> since att[b,w,n] = hs_ob[b,w] @ W_att
    # @ wenc_n[b,n]^T.  (b_att is dropped: constant over the softmax axis.)
    q = jnp.dot(hs_flat, w_att, preferred_element_type=jnp.float32)
    q = q.reshape(tb, mlwp, hp).astype(jnp.bfloat16)

    # att[b, w, n] = <q[b, w], wenc_n[b, n]>  (batched NT dot, no transposed
    # copy materialized).
    att = lax.dot_general(
        q, wenc_n,
        dimension_numbers=(((2,), (2,)), ((0,), (0,))),
        preferred_element_type=jnp.float32)               # [TB, mLwP, mLnP]

    # mask out-of-length / padded NL tokens, softmax over NL axis (lane axis).
    att = att + mask_ref[...]
    att_max = jnp.max(att, axis=2, keepdims=True)
    e = jnp.exp(att - att_max)
    denom = jnp.sum(e, axis=2, keepdims=True)
    p = (e * pl.reciprocal(denom, approx=True)).astype(jnp.bfloat16)

    # context: c_n[b, w, :] = sum_n p[b, w, n] * wenc_n[b, n, :]
    c_n = lax.dot_general(
        p, wenc_n,
        dimension_numbers=(((2,), (1,)), ((0,), (0,))),
        preferred_element_type=jnp.float32)               # [TB, mLwP, hP]

    # hidden = tanh([c_n | hs_ob] @ [A ; B] + b')   -- one K = 2*hP MXU dot
    # (W_c / W_hs / W1 algebraically folded into A, B, b').
    lhs = jnp.concatenate(
        [c_n.astype(jnp.bfloat16).reshape(tb * mlwp, hp), hs_flat], axis=1)
    hid = jnp.tanh(
        jnp.dot(lhs, w_ab, preferred_element_type=jnp.float32) + b1_ref[...])

    # s_wo = hidden @ W2^T + b2  (lane-dense 128-wide bf16 output, sliced
    # and upcast outside).
    s_wo = jnp.dot(hid.astype(jnp.bfloat16), w2_ref[...],
                   preferred_element_type=jnp.float32) + b2_ref[...]
    out_ref[...] = s_wo.reshape(tb, mlwp, -1).astype(out_ref.dtype)


# ------------------------- weight folding (hoisted) ------------------------ #

def fold_wop_params(params, hS, n_cond_ops):
    """Fold W_c / W_hs into the first MLP layer, pad + cast once.

    Called once per parameter set (outside the per-call path)."""
    f32, bf16 = jnp.float32, jnp.bfloat16
    hP = _round_up(hS, 128)
    outP = _round_up(n_cond_ops, 128)

    W_att = params["W_att"].astype(f32)
    W_c = params["W_c"].astype(f32)
    W_hs = params["W_hs"].astype(f32)
    W1 = params["W1"].astype(f32)
    W2 = params["W2"].astype(f32)
    b_c = params["b_c"].astype(f32)
    b_hs = params["b_hs"].astype(f32)
    b1 = params["b1"].astype(f32)
    b2 = params["b2"].astype(f32)
    # (b_att is intentionally dropped: softmax-invariant.)

    W1c_t = W1[:, :hS].T                  # acts on the W_c(c_n) half of vec
    W1h_t = W1[:, hS:].T                  # acts on the W_hs(hs_ob) half
    A = W_c.T @ W1c_t                     # [hS, hS]
    B = W_hs.T @ W1h_t                    # [hS, hS]
    b1f = b_c @ W1c_t + b_hs @ W1h_t + b1

    def pad2(m, rows, cols):
        return jnp.pad(m, ((0, rows - m.shape[0]), (0, cols - m.shape[1])))

    # [W_att ; A ; B]; W_att is NOT transposed because the kernel projects the
    # hs_ob side (q = hs_ob @ W_att).
    w_stack = jnp.concatenate(
        [pad2(W_att, hP, hP), pad2(A, hP, hP), pad2(B, hP, hP)],
        axis=0).astype(bf16)                                   # [3*hP, hP]
    w2_p = pad2(W2.T, hP, outP).astype(bf16)                   # [hP, outP]
    b1_p = jnp.pad(b1f, (0, hP - hS)).reshape(1, hP).astype(f32)
    b2_p = jnp.pad(b2, (0, outP - n_cond_ops)).reshape(1, outP).astype(f32)

    return {"w_stack": w_stack, "w2": w2_p, "b1": b1_p, "b2": b2_p,
            "hS": hS, "n_out": n_cond_ops, "hP": hP, "outP": outP}


# ------------------------------- wrapper ----------------------------------- #

def wop_pallas(wenc_n, wenc_hs_ob, l_n, folded, *, batch_tile=None):
    """wenc_n: [bS, mL_n, hS], wenc_hs_ob: [bS, mL_w, hS], l_n: [bS] int32."""
    f32, bf16 = jnp.float32, jnp.bfloat16

    bS, mL_n, hS = wenc_n.shape
    mL_w = wenc_hs_ob.shape[1]
    hP, outP, n_out = folded["hP"], folded["outP"], folded["n_out"]

    # sublane/lane-grain padding (exact: zero padding + additive mask).
    mLnP = _round_up(mL_n, 8)   # 8-sublane grain only; mask neutralizes pad
    mLwP = _round_up(mL_w, 8)

    # Batch tile: fill the MXU M-dim (target TB*mLwP >= 256) under a ~16 MiB
    # double-buffered activation budget (headroom on v7x's 64 MiB VMEM), while
    # keeping >= 2 "parallel" grid steps when bS allows so both v7x
    # TensorCores get work.
    if batch_tile is None:
        per_b = 2 * 2 * (mLnP * hP + mLwP * hP + mLwP * outP) + 2 * 4 * mLnP
        tb_vmem = max(1, (16 << 20) // per_b)
        tb_mxu = int(pl.cdiv(256, mLwP))
        batch_tile = max(1, min(tb_vmem, tb_mxu, bS))
        if bS >= 2:
            batch_tile = min(batch_tile, max(1, bS // 2))
    TB = int(batch_tile)
    bP = _round_up(bS, TB)

    # ---- activations: cast to bf16 BEFORE padding (halves pad-copy BW) ----
    wenc_n_p = jnp.pad(wenc_n.astype(bf16),
                       ((0, bP - bS), (0, mLnP - mL_n), (0, hP - hS)))
    hs_ob_p = jnp.pad(wenc_hs_ob.astype(bf16),
                      ((0, bP - bS), (0, mLwP - mL_w), (0, hP - hS)))

    # additive NL-length mask (also neutralizes the mL_n / batch padding).
    l_n_p = jnp.pad(l_n.astype(jnp.int32), (0, bP - bS), constant_values=1)
    n_ids = jnp.arange(mLnP, dtype=jnp.int32)[None, :]
    add_mask = jnp.where(n_ids < l_n_p[:, None], 0.0, -1.0e10).astype(f32)
    add_mask = add_mask[:, None, :]                           # [bP, 1, mLnP]

    grid_spec = pltpu.PrefetchScalarGridSpec(
        num_scalar_prefetch=0,
        grid=(bP // TB,),
        in_specs=[
            pl.BlockSpec((TB, mLnP, hP), lambda bt: (bt, 0, 0)),   # wenc_n
            pl.BlockSpec((TB, mLwP, hP), lambda bt: (bt, 0, 0)),   # wenc_hs_ob
            pl.BlockSpec((TB, 1, mLnP), lambda bt: (bt, 0, 0)),    # additive mask
            pl.BlockSpec((3 * hP, hP), lambda bt: (0, 0)),         # [W_att; A; B]
            pl.BlockSpec((1, hP), lambda bt: (0, 0)),              # fused b1
            pl.BlockSpec((hP, outP), lambda bt: (0, 0)),           # W2^T (padded)
            pl.BlockSpec((1, outP), lambda bt: (0, 0)),            # b2 (padded)
        ],
        out_specs=pl.BlockSpec((TB, mLwP, outP), lambda bt: (bt, 0, 0)),
    )

    out = pl.pallas_call(
        wop_kernel,
        out_shape=jax.ShapeDtypeStruct((bP, mLwP, outP), bf16),
        grid_spec=grid_spec,
        compiler_params=pltpu.CompilerParams(
            dimension_semantics=("parallel",),
            vmem_limit_bytes=32 << 20),
    )(wenc_n_p, hs_ob_p, add_mask, folded["w_stack"], folded["b1"],
      folded["w2"], folded["b2"])

    # slice away padding; upcast the (bf16) logits to f32 for downstream use.
    return out[:bS, :mL_w, :n_out].astype(f32)


# ----------------------------- JAX reference ------------------------------ #

def wop_ref(wenc_n, wenc_hs_ob, l_n, params):
    att_n = wenc_n @ params["W_att"].T + params["b_att"]
    att = jnp.einsum("bwh,bnh->bwn", wenc_hs_ob, att_n)
    mask = jnp.arange(wenc_n.shape[1])[None, None, :] < l_n[:, None, None]
    att = jnp.where(mask, att, -1.0e10)
    p = jax.nn.softmax(att, axis=2)
    c_n = jnp.einsum("bwn,bnh->bwh", p, wenc_n)
    vec = jnp.concatenate(
        [c_n @ params["W_c"].T + params["b_c"],
         wenc_hs_ob @ params["W_hs"].T + params["b_hs"]], axis=2)
    hid = jnp.tanh(vec @ params["W1"].T + params["b1"])
    return hid @ params["W2"].T + params["b2"]


# --------------------------------- main ------------------------------------ #

if __name__ == "__main__":
    # Small shapes consistent with the module (hS scaled down from 100 to 32).
    bS, mL_n, mL_hs, hS, mL_w, n_cond_ops = 2, 8, 6, 32, 20, 7
    l_n = jnp.array([8, 5], dtype=jnp.int32)
    wn = [2, 3]
    wc = [[1, 3], [0, 2, 1]]

    key = jax.random.PRNGKey(0)
    keys = jax.random.split(key, 16)

    # Stand-ins for the LSTM encoder outputs (see TODO(synk) at top of file).
    wenc_n = jax.random.normal(keys[0], (bS, mL_n, hS), dtype=jnp.float32)
    wenc_hs = jax.random.normal(keys[1], (bS, mL_hs, hS), dtype=jnp.float32)

    # Glue (host side): wenc_hs_ob = selected where-columns, padded with col 0.
    idx = np.zeros((bS, mL_w), dtype=np.int32)
    for b in range(bS):
        idx[b, :wn[b]] = np.asarray(wc[b], dtype=np.int32)
        idx[b, wn[b]:] = 0
    wenc_hs_ob = wenc_hs[jnp.arange(bS)[:, None], jnp.asarray(idx)]  # [bS, mL_w, hS]

    def uniform(k, shape, fan_in):
        bound = 1.0 / np.sqrt(fan_in)
        return jax.random.uniform(k, shape, jnp.float32, -bound, bound)

    params = {
        "W_att": uniform(keys[2], (hS, hS), hS),  "b_att": uniform(keys[3], (hS,), hS),
        "W_c":   uniform(keys[4], (hS, hS), hS),  "b_c":   uniform(keys[5], (hS,), hS),
        "W_hs":  uniform(keys[6], (hS, hS), hS),  "b_hs":  uniform(keys[7], (hS,), hS),
        "W1":    uniform(keys[8], (hS, 2 * hS), 2 * hS),
        "b1":    uniform(keys[9], (hS,), 2 * hS),
        "W2":    uniform(keys[10], (n_cond_ops, hS), hS),
        "b2":    uniform(keys[11], (n_cond_ops,), hS),
    }

    folded = fold_wop_params(params, hS, n_cond_ops)   # hoisted: done once

    s_wo = wop_pallas(wenc_n, wenc_hs_ob, l_n, folded)
    s_wo = jax.block_until_ready(s_wo)

    s_ref = wop_ref(wenc_n, wenc_hs_ob, l_n, params)
    # bf16 activations/weights/output + EUP approx reciprocal -> loose tolerance.
    np.testing.assert_allclose(np.asarray(s_wo), np.asarray(s_ref),
                               rtol=4e-2, atol=4e-2)
    print("KERNEL_OK")
</pallas_src>

<mosaic_0001>
module attributes {stable_mosaic.version = 11 : i64} {
  func.func @wop_kernel(%arg0: i32, %arg1: memref<1x8x128xbf16, #tpu.memory_space<vmem>>, %arg2: memref<1x24x128xbf16, #tpu.memory_space<vmem>>, %arg3: memref<1x1x8xf32, #tpu.memory_space<vmem>>, %arg4: memref<384x128xbf16, #tpu.memory_space<vmem>>, %arg5: memref<1x128xf32, #tpu.memory_space<vmem>>, %arg6: memref<128x128xbf16, #tpu.memory_space<vmem>>, %arg7: memref<1x128xf32, #tpu.memory_space<vmem>>, %arg8: memref<1x24x128xbf16, #tpu.memory_space<vmem>>) attributes {dimension_semantics = [#tpu.dimension_semantics<parallel>], iteration_bounds = array<i64: 2>, scalar_prefetch = 0 : i64, scratch_operands = 0 : i64, tpu.core_type = #tpu.core_type<tc>, window_params = [{transform_indices = @transform_0, window_bounds = array<i64: 1, 8, 128>}, {transform_indices = @transform_1, window_bounds = array<i64: 1, 24, 128>}, {transform_indices = @transform_2, window_bounds = array<i64: 1, 1, 8>}, {pipeline_mode = #tpu.pipeline_mode<synchronous>, transform_indices = @transform_3, window_bounds = array<i64: 384, 128>}, {pipeline_mode = #tpu.pipeline_mode<synchronous>, transform_indices = @transform_4, window_bounds = array<i64: 1, 128>}, {pipeline_mode = #tpu.pipeline_mode<synchronous>, transform_indices = @transform_5, window_bounds = array<i64: 128, 128>}, {pipeline_mode = #tpu.pipeline_mode<synchronous>, transform_indices = @transform_6, window_bounds = array<i64: 1, 128>}, {transform_indices = @transform_7, window_bounds = array<i64: 1, 24, 128>}]} {
    %c0 = arith.constant 0 : index
    %c0_0 = arith.constant 0 : index
    %c0_1 = arith.constant 0 : index
    %0 = vector.load %arg1[%c0, %c0_0, %c0_1] : memref<1x8x128xbf16, #tpu.memory_space<vmem>>, vector<1x8x128xbf16>
    %c0_2 = arith.constant 0 : index
    %c0_3 = arith.constant 0 : index
    %c0_4 = arith.constant 0 : index
    %1 = vector.load %arg2[%c0_2, %c0_3, %c0_4] : memref<1x24x128xbf16, #tpu.memory_space<vmem>>, vector<1x24x128xbf16>
    %2 = vector.shape_cast %1 : vector<1x24x128xbf16> to vector<24x128xbf16>
    %c0_5 = arith.constant 0 : index
    %c0_6 = arith.constant 0 : index
    %3 = vector.load %arg4[%c0_5, %c0_6] : memref<384x128xbf16, #tpu.memory_space<vmem>>, vector<128x128xbf16>
    %c128 = arith.constant 128 : index
    %c0_7 = arith.constant 0 : index
    %4 = vector.load %arg4[%c128, %c0_7] : memref<384x128xbf16, #tpu.memory_space<vmem>>, vector<256x128xbf16>
    %cst = arith.constant dense<0.000000e+00> : vector<24x128xf32>
    %5 = tpu.matmul %2, %3, %cst {dimension_numbers = #tpu.dot_dimension_numbers<[1], [0], [0], [1], [0, 0, 1, 1], [], []>} : vector<24x128xbf16>, vector<128x128xbf16>, vector<24x128xf32> -> vector<24x128xf32>
    %6 = vector.shape_cast %5 : vector<24x128xf32> to vector<1x24x128xf32>
    %7 = arith.truncf %6 : vector<1x24x128xf32> to vector<1x24x128xbf16>
    %cst_8 = arith.constant dense<0.000000e+00> : vector<1x24x8xf32>
    %8 = tpu.matmul %7, %0, %cst_8 {dimension_numbers = #tpu.dot_dimension_numbers<[2], [2], [1], [1], [0, 0, 0, 1, 1, 1], [0], [0]>} : vector<1x24x128xbf16>, vector<1x8x128xbf16>, vector<1x24x8xf32> -> vector<1x24x8xf32>
    %c0_9 = arith.constant 0 : index
    %c0_10 = arith.constant 0 : index
    %c0_11 = arith.constant 0 : index
    %9 = vector.load %arg3[%c0_9, %c0_10, %c0_11] : memref<1x1x8xf32, #tpu.memory_space<vmem>>, vector<1x1x8xf32>
    %10 = vector.broadcast %9 : vector<1x1x8xf32> to vector<1x24x8xf32>
    %11 = arith.addf %8, %10 : vector<1x24x8xf32>
    %cst_12 = arith.constant dense<0xFF800000> : vector<1x24xf32>
    %12 = vector.multi_reduction <maximumf>, %11, %cst_12 [2] : vector<1x24x8xf32> to vector<1x24xf32>
    %13 = vector.shape_cast %12 : vector<1x24xf32> to vector<1x24x1xf32>
    %14 = vector.broadcast %13 : vector<1x24x1xf32> to vector<1x24x8xf32>
    %15 = arith.subf %11, %14 : vector<1x24x8xf32>
    %16 = math.exp %15 : vector<1x24x8xf32>
    %cst_13 = arith.constant dense<0.000000e+00> : vector<1x24xf32>
    %17 = vector.multi_reduction <add>, %16, %cst_13 [2] : vector<1x24x8xf32> to vector<1x24xf32>
    %18 = vector.shape_cast %17 : vector<1x24xf32> to vector<1x24x1xf32>
    %19 = tpu.reciprocal %18 {approx = true} : vector<1x24x1xf32> -> vector<1x24x1xf32>
    %20 = vector.broadcast %19 : vector<1x24x1xf32> to vector<1x24x8xf32>
    %21 = arith.mulf %16, %20 : vector<1x24x8xf32>
    %22 = arith.truncf %21 : vector<1x24x8xf32> to vector<1x24x8xbf16>
    %cst_14 = arith.constant dense<0.000000e+00> : vector<1x24x128xf32>
    %23 = tpu.matmul %22, %0, %cst_14 {dimension_numbers = #tpu.dot_dimension_numbers<[2], [1], [1], [2], [0, 0, 0, 1, 1, 2], [0], [0]>} : vector<1x24x8xbf16>, vector<1x8x128xbf16>, vector<1x24x128xf32> -> vector<1x24x128xf32>
    %24 = arith.truncf %23 : vector<1x24x128xf32> to vector<1x24x128xbf16>
    %25 = vector.shape_cast %24 : vector<1x24x128xbf16> to vector<24x128xbf16>
    %26 = tpu.concatenate %25, %2 in 1 : vector<24x128xbf16>, vector<24x128xbf16> -> vector<24x256xbf16>
    %cst_15 = arith.constant dense<0.000000e+00> : vector<24x128xf32>
    %27 = tpu.matmul %26, %4, %cst_15 {dimension_numbers = #tpu.dot_dimension_numbers<[1], [0], [0], [1], [0, 0, 1, 1], [], []>} : vector<24x256xbf16>, vector<256x128xbf16>, vector<24x128xf32> -> vector<24x128xf32>
    %c0_16 = arith.constant 0 : index
    %c0_17 = arith.constant 0 : index
    %28 = vector.load %arg5[%c0_16, %c0_17] : memref<1x128xf32, #tpu.memory_space<vmem>>, vector<1x128xf32>
    %29 = vector.broadcast %28 : vector<1x128xf32> to vector<24x128xf32>
    %30 = arith.addf %27, %29 : vector<24x128xf32>
    %31 = math.tanh %30 : vector<24x128xf32>
    %32 = arith.truncf %31 : vector<24x128xf32> to vector<24x128xbf16>
    %c0_18 = arith.constant 0 : index
    %c0_19 = arith.constant 0 : index
    %33 = vector.load %arg6[%c0_18, %c0_19] : memref<128x128xbf16, #tpu.memory_space<vmem>>, vector<128x128xbf16>
    %cst_20 = arith.constant dense<0.000000e+00> : vector<24x128xf32>
    %34 = tpu.matmul %32, %33, %cst_20 {dimension_numbers = #tpu.dot_dimension_numbers<[1], [0], [0], [1], [0, 0, 1, 1], [], []>} : vector<24x128xbf16>, vector<128x128xbf16>, vector<24x128xf32> -> vector<24x128xf32>
    %c0_21 = arith.constant 0 : index
    %c0_22 = arith.constant 0 : index
    %35 = vector.load %arg7[%c0_21, %c0_22] : memref<1x128xf32, #tpu.memory_space<vmem>>, vector<1x128xf32>
    %36 = vector.broadcast %35 : vector<1x128xf32> to vector<24x128xf32>
    %37 = arith.addf %34, %36 : vector<24x128xf32>
    %38 = vector.shape_cast %37 : vector<24x128xf32> to vector<1x24x128xf32>
    %39 = arith.truncf %38 : vector<1x24x128xf32> to vector<1x24x128xbf16>
    %c0_23 = arith.constant 0 : index
    %c0_24 = arith.constant 0 : index
    %c0_25 = arith.constant 0 : index
    %40 = vector.load %arg8[%c0_23, %c0_24, %c0_25] : memref<1x24x128xbf16, #tpu.memory_space<vmem>>, vector<1x24x128xbf16>
    tpu.vector_store %arg8[%c0_23, %c0_24, %c0_25], %39 {strides = array<i32>} : memref<1x24x128xbf16, #tpu.memory_space<vmem>>, vector<1x24x128xbf16>,
    return
  }
  func.func @transform_0(%arg0: i32) -> (i32, i32, i32) {
    %c0_i32 = arith.constant 0 : i32
    %c0_i32_0 = arith.constant 0 : i32
    %c0_i32_1 = arith.constant 0 : i32
    return %arg0, %c0_i32, %c0_i32_0 : i32, i32, i32
  }
  func.func @transform_1(%arg0: i32) -> (i32, i32, i32) {
    %c0_i32 = arith.constant 0 : i32
    %c0_i32_0 = arith.constant 0 : i32
    %c0_i32_1 = arith.constant 0 : i32
    return %arg0, %c0_i32, %c0_i32_0 : i32, i32, i32
  }
  func.func @transform_2(%arg0: i32) -> (i32, i32, i32) {
    %c0_i32 = arith.constant 0 : i32
    %c0_i32_0 = arith.constant 0 : i32
    %c0_i32_1 = arith.constant 0 : i32
    return %arg0, %c0_i32, %c0_i32_0 : i32, i32, i32
  }
  func.func @transform_3(%arg0: i32) -> (i32, i32) {
    %c0_i32 = arith.constant 0 : i32
    %c0_i32_0 = arith.constant 0 : i32
    %c0_i32_1 = arith.constant 0 : i32
    return %c0_i32, %c0_i32_0 : i32, i32
  }
  func.func @transform_4(%arg0: i32) -> (i32, i32) {
    %c0_i32 = arith.constant 0 : i32
    %c0_i32_0 = arith.constant 0 : i32
    %c0_i32_1 = arith.constant 0 : i32
    return %c0_i32, %c0_i32_0 : i32, i32
  }
  func.func @transform_5(%arg0: i32) -> (i32, i32) {
    %c0_i32 = arith.constant 0 : i32
    %c0_i32_0 = arith.constant 0 : i32
    %c0_i32_1 = arith.constant 0 : i32
    return %c0_i32, %c0_i32_0 : i32, i32
  }
  func.func @transform_6(%arg0: i32) -> (i32, i32) {
    %c0_i32 = arith.constant 0 : i32
    %c0_i32_0 = arith.constant 0 : i32
    %c0_i32_1 = arith.constant 0 : i32
    return %c0_i32, %c0_i32_0 : i32, i32
  }
  func.func @transform_7(%arg0: i32) -> (i32, i32, i32) {
    %c0_i32 = arith.constant 0 : i32
    %c0_i32_0 = arith.constant 0 : i32
    %c0_i32_1 = arith.constant 0 : i32
    return %arg0, %c0_i32, %c0_i32_0 : i32, i32, i32
  }
}

</mosaic_0001>

<bundles_post_ra>
// kernel: tpu_custom_call.1
= control target key start
LH: loop header
LB: loop body
LE: loop exit
PB: predicated region body
PF: predicated region fallthrough
CT: control target
= control target key end

     0   :  { %s2002_s0 = inlined_call_operand.hbm [shape: bf16[2,8,128], index: 0, kind: input, shape index: {}]   ;;  %s2003_s1 = inlined_call_operand.hbm [shape: bf16[2,24,128], index: 1, kind: input, shape index: {}]   ;;  %s2004_s2 = inlined_call_operand.vmem [shape: f32[2,1,8], index: 2, kind: input, shape index: {}]   ;;  %s2005_s3 = inlined_call_operand.hbm [shape: bf16[384,128], index: 3, kind: input, shape index: {}]   ;;  %s2006_s4 = inlined_call_operand.vmem [shape: f32[1,128], index: 4, kind: input, shape index: {}]   ;;  %s2007_s5 = inlined_call_operand.hbm [shape: bf16[128,128], index: 5, kind: input, shape index: {}]   ;;  %s2008_s6 = inlined_call_operand.vmem [shape: f32[1,128], index: 6, kind: input, shape index: {}]   ;;  %s2009_s7 = inlined_call_operand.hbm [shape: bf16[2,24,128], index: 7, kind: output, shape index: {}]  }
   0x1   :  { %2015 = sst [smem:[#allocation16_spill]] %s2002_s0 }
   0x2   :  { %2016 = sst [smem:[#allocation17_spill]] %s2005_s3 }
   0x3   :  { %2017 = sst [smem:[#allocation18_spill]] %s2007_s5 }
   0x4   :  { %12 = vsyncpa [#allocation3], 0 }
   0x5   :  { %14 = vsyncpa [#allocation3 + $0x1], 0 }
   0x6   :  { %15 = vsyncpa [#allocation6], 0 }
   0x7   :  { %17 = vsyncpa [#allocation6 + $0x1], 0 }
   0x8   :  { %18 = vsyncpa [#allocation9], 0 }
   0x9   :  { %19 = vsyncpa [#allocation4], 0 }
   0xa   :  { %21 = vsyncpa [#allocation4 + $0x1], 0  ;;  %s1667_s24 = smov 0   ;;  %s1669_s25 = smov 0  }
   0xb   :  { %s1671_s26 = smov 0   ;;  %s1673_s27 = smov 0  }
   0xc LB: > { %s1688_s28 = sadd.s32 4294967295, %s1616_s27   ;;  %s1118_s29 = sadd.s32 4294967294, %s1616_s27   ;;  %s1616_s27 = sphi %s1673_s27, %s2042_s27   ;;  %s1612_s26 = sphi %s1671_s26, %s2041_s26   ;;  %s1608_s25 = sphi %s1669_s25, %s2040_s25   ;;  %s1604_s24 = sphi %s1667_s24, %s2039_s24  }
   0xd   : > { %p47_p0 = scmp.ne.s32.totalorder %s1608_s25, %s1604_s24  ;;  %p2010_p1 = scmp.eq.s32.totalorder %s1688_s28, 0 }
   0xe   : > { %p213_p3 = scmp.eq.s32.totalorder %s1118_s29, 1  ;;  %p1119_p5 = scmp.ge.s32.totalorder %s1616_s27, 1 }
   0xf   : > { %p1697_p4 = por %p2010_p1, %p47_p0  ;;  %p220_p7 = scmp.lt.s32.totalorder %s1616_s27, 3 }
  0x10   : > { %p1702_p6 = por %p213_p3, %p47_p0  ;;  %s1618_s10 = smov [#allocation7]  }
  0x11   : > { %s2018_s30 = scalar_select %p1697_p4, 1, 0 }
  0x12   : > { %s2019_s8 = scalar_select %p1702_p6, 1, 0 }
  0x13   : > { %p1707_p8 = pnand %p1119_p5, %p220_p7  ;;  %s232_s11 = sshll.u32 %s1618_s10, 4  ;;  %s1711_s11 = int_to_ptr.vmem [resolvable:$true] %s232_s11 }
  0x14   : > { %s1619_s13 = smov [#allocation8]   ;;  %s2022_s3 = sld [smem:[#allocation17_spill]] }
  0x15   : > { %p1308_p9 = pneg %p1707_p8  ;;  %s248_s14 = sshll.u32 %s1619_s13, 4  ;;  %s1722_s14 = int_to_ptr.vmem [resolvable:$true] %s248_s14 }
  0x17   : > { %p1718_p11 = pnand %p1308_p9, %p2010_p1 }
  0x19   : > { %p1424_p13 = pneg %p1718_p11 }
  0x1a   : > { %s1422_s17 = scalar_lea.hbm %s2022_s3, 3072 }
  0x1b   : > { %p1423_p12 = scmp.ne.s32.totalorder %s2022_s3, %s1422_s17  ;;  %p1429_p5 = scmp.lt.u32.totalorder %s1422_s17, %s2022_s3 }
  0x1d   : > { %p1425_p0 = pnand %p1424_p13, %p1423_p12 }
  0x1f   : > { %p1426_p3 = pneg %p1425_p0 }
  0x21   : > { %p1431_p7 = pnand %p1429_p5, %p1426_p3 }
  0x23   : > { %1434 = shalt.err (!%p1431_p7)
}
  0x24   : > { %s1435_s22 = scalar_lea.vmem %s1711_s11, 3072  ;;  %p1443_p2 = scmp.lt.s32.totalorder %s1711_s11, %s1711_s11 }
  0x25   : > { %p1436_p9 = scmp.ne.s32.totalorder %s1711_s11, %s1435_s22  ;;  %p1444_p12 = scmp.lt.s32.totalorder %s1435_s22, %s1435_s22 }
  0x27   : > { %p1438_p10 = pnand %p1436_p9, %p1424_p13  ;;  %p1445_p0 = por %p1444_p12, %p1443_p2 }
  0x29   : > { %p1439_p1 = pneg %p1438_p10 }
  0x2b   : > { %p1446_p6 = pnand %p1445_p0, %p1439_p1 }
  0x2d   : > { %1449 = shalt.err (!%p1446_p6)
}
  0x2e   : > { %s2011_s23 = smov 64   ;;  %s2012_s29 = smov 4  }
  0x2f   : > { %1311 = dma.hbm_to_vmem [thread:$0]  (!%p1718_p11), %s2022_s3, 3072, %s1711_s11, [#allocation6], %s2011_s23, %s2011_s23, %s2012_s29  }
  0x30   : > { %s2023_s5 = sld [smem:[#allocation18_spill]] }
  0x36   : > { %s1450_s17 = scalar_lea.hbm %s2023_s5, 1024 }
  0x37   : > { %p1451_p1 = scmp.ne.s32.totalorder %s2023_s5, %s1450_s17  ;;  %p1457_p10 = scmp.lt.u32.totalorder %s1450_s17, %s2023_s5 }
  0x39   : > { %p1453_p2 = pnand %p1451_p1, %p1424_p13 }
  0x3b   : > { %p1454_p6 = pneg %p1453_p2 }
  0x3d   : > { %p1459_p3 = pnand %p1457_p10, %p1454_p6 }
  0x3f   : > { %1462 = shalt.err (!%p1459_p3)
}
  0x40   : > { %s1463_s11 = scalar_lea.vmem %s1722_s14, 1024  ;;  %p1471_p12 = scmp.lt.s32.totalorder %s1722_s14, %s1722_s14 }
  0x41   : > { %p1464_p5 = scmp.ne.s32.totalorder %s1722_s14, %s1463_s11  ;;  %p1472_p0 = scmp.lt.s32.totalorder %s1463_s11, %s1463_s11 }
  0x43   : > { %p1466_p7 = pnand %p1464_p5, %p1424_p13  ;;  %p1473_p1 = por %p1472_p0, %p1471_p12 }
  0x45   : > { %p1467_p9 = pneg %p1466_p7 }
  0x47   : > { %p1474_p2 = pnand %p1473_p1, %p1467_p9 }
  0x49   : > { %1477 = shalt.err (!%p1474_p2)
}
  0x4a   : > { %1314 = dma.hbm_to_vmem [thread:$0]  (!%p1718_p11), %s2023_s5, 1024, %s1722_s14, [#allocation9], %s2011_s23, %s2011_s23, %s2012_s29  }
  0x4b   : > { %s1783_s12 = sadd.s32 1, %s1616_s27   ;;  %s34_s13 = sadd.s32 1, %s1612_s26 }
  0x4c   : > { %s31_s15 = ssub.s32 %s1616_s27, %s1783_s12  ;;  %p41_p13 = scmp.ne.s32.totalorder %s1612_s26, %s1608_s25 }
  0x4d   : > { %p32_p6 = scmp.eq.s32.totalorder %s31_s15, 0  ;;  %p42_p10 = scmp.eq.s32.totalorder %s1616_s27, 0 }
  0x4e   : > { %p2024_p3 = scmp.eq.s32.totalorder %s1688_s28, 1  ;;  %p1328_p7 = scmp.lt.s32.totalorder %s1616_s27, 2 }
  0x4f   : > { %s1799_s17 = scalar_select %p32_p6, %s1612_s26, %s34_s13  }
  0x50   : > { %p1793_p5 = por %p2024_p3, %p41_p13  ;;  %p43_p9 = por %p42_p10, %p41_p13 }
  0x51   : > { %s1802_s18 = sand.u32 1, %s1612_s26   ;;  %s1124_s19 = sshll.u32 %s1616_s27, 6 }
  0x52   : > { %s2025_s16 = scalar_select %p1793_p5, 1, 0 }
  0x53   : > { %s1123_s14 = sshll.u32 %s1802_s18, 2  ;;  %s2026_s0 = sld [smem:[#allocation16_spill]] }
  0x54   : > { %s269_s22 = scalar_lea.vmem [#allocation2], %s1123_s14  ;;  %p1813_p11 = pnand %p1328_p7, %p43_p9 }
  0x55   : > { %s276_s10 = sshll.u32 %s269_s22, 4  ;;  %s1290_s15 = smul.u32 12, %s1802_s18  ;;  %s1811_s10 = int_to_ptr.vmem [resolvable:$true] %s276_s10 }
  0x56   : > { %s266_s29 = scalar_lea.sflag [#allocation3], %s1802_s18  ;;  %p1480_p0 = pneg %p1813_p11 }
  0x59   : > { %s1809_s11 = scalar_lea.hbm %s2026_s0, %s1124_s19  ;;  %s1483_s21 = scalar_lea.hbm %s2026_s0, 128 }
  0x5a   : > { %s1478_s20 = scalar_lea.hbm %s1809_s11, 64  ;;  %p1484_p13 = scmp.lt.u32.totalorder %s1809_s11, %s2026_s0 }
  0x5b   : > { %p1479_p12 = scmp.ne.s32.totalorder %s1809_s11, %s1478_s20  ;;  %p1485_p6 = scmp.lt.u32.totalorder %s1483_s21, %s1478_s20 }
  0x5c   : > { %p1487_p3 = scmp.lt.u32.totalorder %s1478_s20, %s1809_s11 }
  0x5d   : > { %p1481_p1 = pnand %p1480_p0, %p1479_p12  ;;  %p1486_p10 = por %p1485_p6, %p1484_p13 }
  0x5f   : > { %p1482_p2 = pneg %p1481_p1  ;;  %p1488_p7 = por %p1487_p3, %p1486_p10 }
  0x61   : > { %p1489_p9 = pnand %p1488_p7, %p1482_p2 }
  0x63   : > { %1492 = shalt.err (!%p1489_p9)
}
  0x64   : > { %s1493_s23 = scalar_lea.vmem %s1811_s10, 64  ;;  %s1622_s14 = smov [#allocation2]  }
  0x65   : > { %p1494_p12 = scmp.ne.s32.totalorder %s1811_s10, %s1493_s23  ;;  %s1498_s19 = sshll.u32 %s1622_s14, 4  ;;  %s1499_s19 = int_to_ptr.vmem [resolvable:$false] %s1498_s19 }
  0x66   : > { %s1500_s3 = scalar_lea.vmem %s1499_s19, 128  ;;  %p1501_p4 = scmp.lt.s32.totalorder %s1811_s10, %s1499_s19 }
  0x67   : > { %p1496_p1 = pnand %p1494_p12, %p1480_p0  ;;  %p1502_p13 = scmp.lt.s32.totalorder %s1500_s3, %s1493_s23 }
  0x69   : > { %p1497_p5 = pneg %p1496_p1  ;;  %p1503_p6 = por %p1502_p13, %p1501_p4 }
  0x6b   : > { %p1504_p10 = pnand %p1503_p6, %p1497_p5 }
  0x6d   : > { %1507 = shalt.err (!%p1504_p10)
}
  0x6e   : > { %1318 = dma.hbm_to_vmem [thread:$0]  (!%p1813_p11), %s1809_s11, 64, %s1811_s10, %s266_s29  }
  0x6f   : > { %s1291_s20 = smul.u32 192, %s1616_s27  ;;  %s287_s21 = scalar_lea.vmem [#allocation5], %s1290_s15 }
  0x70   : > { %s294_s22 = sshll.u32 %s287_s21, 4  ;;  %s2028_s3 = sand.u32 1, %s1616_s27   ;;  %s1848_s22 = int_to_ptr.vmem [resolvable:$true] %s294_s22 }
  0x71   : > { %s1853_s19 = scalar_lea.hbm %s2003_s1, %s1291_s20  ;;  %s1857_s0 = scalar_lea.sflag [#allocation6], %s2028_s3 }
  0x72   : > { %s1508_s5 = scalar_lea.hbm %s1853_s19, 192  ;;  %s1513_s11 = scalar_lea.hbm %s2003_s1, 384 }
  0x73   : > { %p1509_p4 = scmp.ne.s32.totalorder %s1853_s19, %s1508_s5  ;;  %p1514_p3 = scmp.lt.u32.totalorder %s1853_s19, %s2003_s1 }
  0x74   : > { %p1515_p7 = scmp.lt.u32.totalorder %s1513_s11, %s1508_s5  ;;  %p1517_p12 = scmp.lt.u32.totalorder %s1508_s5, %s1853_s19 }
  0x75   : > { %p1511_p5 = pnand %p1509_p4, %p1480_p0 }
  0x76   : > { %p1516_p9 = por %p1515_p7, %p1514_p3 }
  0x77   : > { %p1512_p2 = pneg %p1511_p5 }
  0x78   : > { %p1518_p1 = por %p1517_p12, %p1516_p9 }
  0x7a   : > { %p1519_p13 = pnand %p1518_p1, %p1512_p2 }
  0x7c   : > { %1522 = shalt.err (!%p1519_p13)
}
  0x7d   : > { %s1523_s20 = scalar_lea.vmem %s1848_s22, 192  ;;  %s1623_s21 = smov [#allocation5]  }
  0x7e   : > { %p1524_p6 = scmp.ne.s32.totalorder %s1848_s22, %s1523_s20  ;;  %s1528_s14 = sshll.u32 %s1623_s21, 4  ;;  %s1529_s14 = int_to_ptr.vmem [resolvable:$false] %s1528_s14 }
  0x7f   : > { %s1530_s23 = scalar_lea.vmem %s1529_s14, 384  ;;  %p1531_p5 = scmp.lt.s32.totalorder %s1848_s22, %s1529_s14 }
  0x80   : > { %p1526_p10 = pnand %p1524_p6, %p1480_p0  ;;  %p1532_p3 = scmp.lt.s32.totalorder %s1530_s23, %s1523_s20 }
  0x82   : > { %p1527_p4 = pneg %p1526_p10  ;;  %p1533_p7 = por %p1532_p3, %p1531_p5 }
  0x84   : > { %p1534_p9 = pnand %p1533_p7, %p1527_p4 }
  0x86   : > { %1537 = shalt.err (!%p1534_p9)
}
  0x87   : > { %s2029_s5 = smov 4   ;;  %s2030_s3 = smov 64  }
  0x88   : > { %1321 = dma.hbm_to_vmem [thread:$0]  (!%p1813_p11), %s1853_s19, 192, %s1848_s22, %s1857_s0, %s2030_s3, %s2030_s3, %s2029_s5  }
  0x89   : > { %312 = sbr.rel (%p1707_p8) target bundleno = 1632 (0x660), region = 48  ;;  %s1889_s29 = sand.u32 (!%p1707_p8), 1, %s1608_s25  }
  0x8a   : > { %s1127_s18 = sshll.u32 (!%p1707_p8), %s1889_s29, 2  ;;  %s315_s11 = scalar_lea.sflag (!%p1707_p8), [#allocation3], %s1889_s29 }
  0x8b   : > { %s318_s10 = scalar_lea.vmem (!%p1707_p8), [#allocation2], %s1127_s18  ;;  %p2031_p0 = scmp.ne.s32.totalorder (!%p1707_p8), %s2018_s30, 0 }
  0x90   : > { %1583 = dma.done.wait (%p2031_p0), %s315_s11, 64  }
  0x91   : > { %1585 = vsyncadd (%p2031_p0), %s315_s11, 4294967232  ;;  %s323_s0 = sand.u32 1, %s1688_s28   ;;  %s1292_s9 = smul.u32 12, %s1889_s29 }
  0x92   : > { %s324_s13 = scalar_lea.sflag [#allocation6], %s323_s0 }
  0x93   : > { %s1901_s22 = scalar_lea.vmem [#allocation5], %s1292_s9 }
  0x94   : > { %1587 = dma.done.wait (%p2031_p0), %s324_s13, 192  }
  0x95   : > { %1589 = vsyncadd (%p2031_p0), %s324_s13, 4294967104  ;;  %p2032_p8 = scmp.eq.s32.totalorder %s1688_s28, 0 }
  0x97   : > { %1591 = dma.done.wait (%p2032_p8), [#allocation6], 3072   ;;  %p2033_p11 = pmov %p2032_p8 }
  0x98   : > { %p2034_p2 = pmov %p2032_p8 }
  0x99   : > { %1593 = vsyncadd (%p2033_p11), [#allocation6], 4294964224 }
  0x9a   : > { %1595 = dma.done.wait (%p2034_p2), [#allocation9], 1024   ;;  %p2035_p12 = pmov %p2034_p2 }
  0x9b   : > { %v1370_v0 = vld [vmem:[#allocation7] sm:$0xff]   ;;  %v1371_v1 = vld [vmem:[#allocation7 + $0x8] sm:$0xff]   ;;  %v1372_v2 = vld [vmem:[#allocation7 + $0x10] sm:$0xff]   ;;  %p374_p1 = scmp.lt.s32.totalorder %s1688_s28, 1  ;;  %vm593_vm0 = vcmask 64512   ;;  %vm635_vm1 = vcmask 1043456  }
  0x9c   : > { %1597 = vsyncadd (%p2035_p12), [#allocation9], 4294966272  ;;  %1237 = vmatprep.subr.bf16.mxu0 %v1370_v0  ;;  %v1373_v3 = vld [vmem:[#allocation7 + $0x18] sm:$0xff]   ;;  %v1918_v5 = vld [vmem:[%s318_s10] sm:$0xf]  ;;  %s373_s3 = scalar_lea.vmem [#allocation10], %s1292_s9 }
  0x9d   : > { %1238 = vmatpush3.bf16.msra.mxu0 %v1370_v0  ;;  %v1916_v4 = vld [vmem:[%s1901_s22] sm:$0xff]   ;;  %v1374_v6 = vld [vmem:[#allocation7 + $0x20] sm:$0xff]   ;;  %1257 = vmatprep.subr.bf16.mxu1 %v1918_v5  ;;  %v1924_v10 = vld [vmem:[%s1901_s22 + $0x8] ss:$0 sps:$4 sm:$0xff]   ;;  %s375_s30 = scalar_select %p374_p1, %s1688_s28, 1  ;;  %v637_v43 = vsel %vm635_vm1, %v1918_v5, 0 }
  0x9e   : > { %1239 = vmatprep.subr.bf16.mxu0 %v1371_v1  ;;  %1253 = vmatprep.mubr.bf16.mxu0 %v1916_v4  ;;  %v1375_v7 = vld [vmem:[#allocation7 + $0x28] sm:$0xff]   ;;  %v1376_v8 = vld [vmem:[#allocation7 + $0x30] sm:$0xff]   ;;  %v1377_v9 = vld [vmem:[#allocation7 + $0x38] sm:$0xff]   ;;  %s994_s18 = sshll.u32 %s373_s3, 4  ;;  %s1293_s11 = smul.u32 192, %s1688_s28  ;;  %s1953_s18 = int_to_ptr.vmem [resolvable:$true] %s994_s18 }
  0x9f   : > { %1258 = vmatpush3.bf16.xpose.msra.mxu1 %v1918_v5  ;;  %s376_s20 = scalar_lea.vmem %s2004_s2, %s375_s30  ;;  %v1380_v44 = vld [vmem:[#allocation7 + $0x80] sm:$0xff]   ;;  %v1382_v57 = vld [vmem:[#allocation7 + $0x88] sm:$0xff]   ;;  %v1384_v59 = vld [vmem:[#allocation7 + $0x90] sm:$0xff]   ;;  %s981_s9 = scalar_lea.sflag [#allocation4], %s1889_s29 }
  0xa0   : > { %v1140_v17 = vld [vmem:[%s376_s20] ss:$0 sm:$0xff]  ;;  %1289 = vmatprep.subr.msk.bf16.mxu1 %vm635_vm1, %v1918_v5  ;;  %v1383_v58 = vld [vmem:[#allocation7 + $0x48] sm:$0xff]   ;;  %v1385_v60 = vld [vmem:[#allocation7 + $0x50] sm:$0xff]   ;;  %s1958_s13 = scalar_lea.hbm %s2009_s7, %s1293_s11  ;;  %s1538_s28 = scalar_lea.vmem %s1953_s18, 192 }
  0xa1   : > { %1240 = vmatpush3.bf16.msra.mxu0 %v1371_v1  ;;  %v1381_v56 = vld [vmem:[#allocation7 + $0x40] sm:$0xff]   ;;  %v1386_v61 = vld [vmem:[#allocation7 + $0x98] sm:$0xff]   ;;  %v1390_v1 = vld [vmem:[#allocation7 + $0xa8] sm:$0xff]   ;;  %p1539_p13 = scmp.ne.s32.totalorder %s1953_s18, %s1538_s28  ;;  %p2036_p6 = scmp.ne.s32.totalorder %s2025_s16, 0 }
  0xa2   : > { %1241 = vmatprep.subr.bf16.mxu0 %v1372_v2  ;;  %v1387_v62 = vld [vmem:[#allocation7 + $0x58] sm:$0xff]   ;;  %v1388_v63 = vld [vmem:[#allocation7 + $0xa0] sm:$0xff]   ;;  %s1624_s22 = smov [#allocation10]  }
  0xa3   : > { %v1389_v0 = vld [vmem:[#allocation7 + $0x60] sm:$0xff]   ;;  %v1394_v5 = vld [vmem:[#allocation7 + $0xb8] sm:$0xff]   ;;  %p1540_p10 = pnand %p1539_p13, %p2036_p6  ;;  %s1542_s30 = sshll.u32 %s1624_s22, 4  ;;  %s1543_s30 = int_to_ptr.vmem [resolvable:$false] %s1542_s30 }
  0xa4   : > { %s1544_s19 = scalar_lea.vmem %s1543_s30, 384  ;;  %p1545_p5 = scmp.lt.s32.totalorder %s1953_s18, %s1543_s30 }
  0xa5   : > { %1242 = vmatpush3.bf16.msra.mxu0 %v1372_v2  ;;  %v1391_v2 = vld [vmem:[#allocation7 + $0x68] sm:$0xff]   ;;  %p1541_p4 = pneg %p1540_p10  ;;  %p1546_p3 = scmp.lt.s32.totalorder %s1544_s19, %s1538_s28 }
  0xa6   : > { %1243 = vmatprep.subr.bf16.mxu0 %v1373_v3 }
  0xa7   : > { %p1547_p7 = por %p1546_p3, %p1545_p5 }
  0xa9   : > { %1244 = vmatpush3.bf16.msra.mxu0 %v1373_v3  ;;  %v1392_v3 = vld [vmem:[#allocation7 + $0xb0] sm:$0xff]   ;;  %p1548_p9 = pnand %p1547_p7, %p1541_p4 }
  0xaa   : > { %1245 = vmatprep.subr.bf16.mxu0 %v1374_v6 }
  0xad   : > { %1246 = vmatpush3.bf16.msra.mxu0 %v1374_v6  ;;  %v1395_v6 = vld [vmem:[#allocation7 + $0x78] sm:$0xff]  }
  0xae   : > { %1247 = vmatprep.subr.bf16.mxu0 %v1375_v7 }
  0xb1   : > { %1248 = vmatpush3.bf16.msra.mxu0 %v1375_v7  ;;  %v1396_v7 = vld [vmem:[#allocation8] sm:$0xff]  }
  0xb2   : > { %1249 = vmatprep.subr.bf16.mxu0 %v1376_v8 }
  0xb5   : > { %1250 = vmatpush3.bf16.msra.mxu0 %v1376_v8  ;;  %v1397_v8 = vld [vmem:[#allocation8 + $0x8] sm:$0xff]  }
  0xb6   : > { %1251 = vmatprep.subr.bf16.mxu0 %v1377_v9 }
  0xb9   : > { %1252 = vmatpush3.bf16.msra.mxu0 %v1377_v9 }
  0xba   : > { %1269 = vmatprep.subr.bf16.mxu0 %v1396_v7 }
  0xbc   : > { %1254 = vmatmul.mubr.bf16.vlgmr.msra.gmra.mrb[0].mxu0 %v1924_v10 }
  0xbd   : > { %1270 = vmatpush3.bf16.msra.mxu0 %v1396_v7 }
  0xbe   : > { %1271 = vmatprep.subr.bf16.mxu0 %v1397_v8 }
  0xc1   : > { %1272 = vmatpush3.bf16.msra.mxu0 %v1397_v8 }
 0x18f   : > { %v1255_v11 = vpop.f32.mrb[0].mxu0 }
 0x190   : > { %v522_v12 = vpop.f32.mrb[1].mxu0  ;;  %v537_v16 = vpack.c.bf16 %v1255_v11, %v1255_v11 }
 0x191   : > { %v1256_v13 = vpop.f32.mrb[2].mxu0 }
 0x192   : > { %v525_v14 = vpop.f32.mrb[3].mxu0 }
 0x193   : > { %v536_v15 = vpack.c.bf16 %v525_v14, %v522_v12 }
 0x195   : > { %1259 = vmatprep.mubr.bf16.mxu1 %v536_v15 }
 0x196   : > { %1260 = vmatmul.mubr.bf16.vlgmr.msra.gmra.mrb[0].mxu1 %v537_v16  ;;  %v1398_v16 = vld [vmem:[#allocation8 + $0x10] sm:$0xff]  }
 0x197   : > { %1264 = vmatpush3.bf16.msra.mxu1 %v637_v43  ;;  %1273 = vmatprep.subr.bf16.mxu0 %v1398_v16 }
 0x198   : > { %1199 = vmatprep.subr.bf16.mxu1 %v1380_v44  ;;  %1274 = vmatpush3.bf16.msra.mxu0 %v1398_v16 }
 0x269   : > { %v1261_v18 = vpop.f32.mrb[0].mxu1 }
 0x26a   : > { %v588_v19 = vadd.f32 %v1261_v18, %v1140_v17  ;;  %v579_v20 = vpop.f32.mrb[1].mxu1  ;;  %v1400_v18 = vld [vmem:[#allocation8 + $0x20] sm:$0xff]  }
 0x26b   : > { %v580_v21 = vadd.f32 %v1140_v17, %v579_v20  ;;  %v1262_v22 = vpop.f32.mrb[2].mxu1  ;;  %v1402_v20 = vld [vmem:[#allocation8 + $0x30] sm:$0xff]  }
 0x26c   : > { %v582_v23 = vpop.f32.mrb[3].mxu1  ;;  %v600_v24 = vsel %vm593_vm0, %v588_v19, -inf  ;;  %v1143_v22 = vld [vmem:[%s2006_s4] ss:$0 sm:$0xff] }
 0x26d   : > { %v583_v25 = vadd.f32 %v1140_v17, %v582_v23  ;;  %601 = vmax.xlane.f32.xlu1 %v600_v24  ;;  %v594_v26 = vsel %vm593_vm0, %v580_v21, -inf  ;;  %v1399_v17 = vld [vmem:[#allocation8 + $0x18] sm:$0xff]  }
 0x26e   : > { %595 = vmax.xlane.f32.xlu0 %v594_v26  ;;  %1275 = vmatprep.subr.bf16.mxu0 %v1399_v17 }
 0x26f   : > { %v597_v27 = vsel %vm593_vm0, %v583_v25, -inf  ;;  %1276 = vmatpush3.bf16.msra.mxu0 %v1399_v17 }
 0x270   : > { %1277 = vmatprep.subr.bf16.mxu0 %v1400_v18 }
 0x272   : > { %598 = vmax.xlane.f32.xlu0 %v597_v27 }
 0x273   : > { %1278 = vmatpush3.bf16.msra.mxu0 %v1400_v18 }
 0x2fa   : > { %v602_v28 = vpop.xlane.xlu1 %601 }
 0x2fb   : > { %v605_v29 = vsub.f32 %v588_v19, %v602_v28  ;;  %v596_v30 = vpop.xlane.xlu0 %595  ;;  %v1401_v19 = vld [vmem:[#allocation8 + $0x28] sm:$0xff]  }
 0x2fc   : > { %v603_v31 = vsub.f32 %v580_v21, %v596_v30  ;;  %1279 = vmatprep.subr.bf16.mxu0 %v1401_v19  ;;  %v1403_v21 = vld [vmem:[#allocation8 + $0x38] sm:$0xff]  }
 0x2fd   : > { %v610_v32 = vmul.f32 1.442695, %v605_v29  ;;  %1280 = vmatpush3.bf16.msra.mxu0 %v1401_v19 }
 0x2fe   : > { %v606_v33 = vmul.f32 1.442695, %v603_v31  ;;  %1281 = vmatprep.subr.bf16.mxu0 %v1402_v20 }
 0x2ff   : > { %v599_v34 = vpop.xlane.xlu0 %598 }
 0x300   : > { %1404 = vpow2.f32 %v606_v33  ;;  %v604_v35 = vsub.f32 %v583_v25, %v599_v34 }
 0x301   : > { %1406 = vpow2.f32 %v610_v32  ;;  %1282 = vmatpush3.bf16.msra.mxu0 %v1402_v20 }
 0x302   : > { %v608_v36 = vmul.f32 1.442695, %v604_v35  ;;  %1283 = vmatprep.subr.bf16.mxu0 %v1403_v21 }
 0x304   : > { %1408 = vpow2.f32 %v608_v36 }
 0x305   : > { %1284 = vmatpush3.bf16.msra.mxu0 %v1403_v21 }
 0x30a   : > { %v1405_v37 = vpop.eup %1404 }
 0x30b   : > { %v612_v38 = vsel %vm593_vm0, %v1405_v37, 0.0  ;;  %v1407_v39 = vpop.eup %1406 }
 0x30c   : > { %613 = vadd.xlane.f32.xlu1 %v612_v38  ;;  %v618_v41 = vsel %vm593_vm0, %v1407_v39, 0.0 }
 0x30e   : > { %v1409_v40 = vpop.eup %1408 }
 0x30f   : > { %v615_v42 = vsel %vm593_vm0, %v1409_v40, 0.0 }
 0x310   : > { %619 = vadd.xlane.f32.xlu1 %v618_v41  ;;  %616 = vadd.xlane.f32.xlu0 %v615_v42  ;;  %v1160_v41 = vld [vmem:[%s2008_s6] ss:$0 sm:$0xff] }
 0x399   : > { %v614_v45 = vpop.xlane.xlu1 %613 }
 0x39a   : > { %1410 = vrcp.f32 %v614_v45 }
 0x39d   : > { %v620_v46 = vpop.xlane.xlu1 %619  ;;  %v617_v47 = vpop.xlane.xlu0 %616 }
 0x39e   : > { %1412 = vrcp.f32 %v620_v46 }
 0x39f   : > { %1414 = vrcp.f32 %v617_v47 }
 0x3a4   : > { %v1411_v48 = vpop.eup %1410 }
 0x3a5   : > { %v624_v52 = vmul.f32 %v1411_v48, %v1405_v37 }
 0x3a8   : > { %v1413_v49 = vpop.eup %1412 }
 0x3a9   : > { %v1415_v50 = vpop.eup %1414  ;;  %v626_v51 = vmul.f32 %v1413_v49, %v1407_v39 }
 0x3aa   : > { %v625_v53 = vmul.f32 %v1415_v50, %v1409_v40 }
 0x3ab   : > { %v628_v54 = vpack.c.bf16 %v626_v51, %v626_v51 }
 0x3ac   : > { %v627_v55 = vpack.c.bf16 %v625_v53, %v624_v52 }
 0x3ae   : > { %1265 = vmatprep.mubr.msk.bf16.mxu1 %vm593_vm0, %v627_v55 }
 0x3af   : > { %1266 = vmatmul.mubr.msk.bf16.vlgmr.msra.gmra.mrb[4].mxu1 %vm593_vm0, %v628_v54 }
 0x3b0   : > { %1200 = vmatpush3.bf16.msra.mxu1 %v1381_v56  ;;  %824 = vmatprep.mubr.bf16.mxu1 %v1916_v4  ;;  %v1393_v4 = vld [vmem:[#allocation7 + $0x70] sm:$0xff]  }
 0x3b1   : > { %1201 = vmatprep.subr.bf16.mxu1 %v1382_v57 }
 0x3b4   : > { %1202 = vmatpush3.bf16.msra.mxu1 %v1383_v58 }
 0x3b5   : > { %1203 = vmatprep.subr.bf16.mxu1 %v1384_v59 }
 0x3b8   : > { %1204 = vmatpush3.bf16.msra.mxu1 %v1385_v60 }
 0x3b9   : > { %1205 = vmatprep.subr.bf16.mxu1 %v1386_v61 }
 0x3bc   : > { %1206 = vmatpush3.bf16.msra.mxu1 %v1387_v62 }
 0x3bd   : > { %1207 = vmatprep.subr.bf16.mxu1 %v1388_v63 }
 0x3c0   : > { %1208 = vmatpush3.bf16.msra.mxu1 %v1389_v0 }
 0x3c1   : > { %1209 = vmatprep.subr.bf16.mxu1 %v1390_v1 }
 0x3c4   : > { %1210 = vmatpush3.bf16.msra.mxu1 %v1391_v2 }
 0x3c5   : > { %1211 = vmatprep.subr.bf16.mxu1 %v1392_v3 }
 0x3c8   : > { %1212 = vmatpush3.bf16.msra.mxu1 %v1393_v4 }
 0x3c9   : > { %1213 = vmatprep.subr.bf16.mxu1 %v1394_v5 }
 0x3cc   : > { %1214 = vmatpush3.bf16.msra.mxu1 %v1395_v6 }
 0x482   : > { %v1267_v9 = vpop.f32.mrb[4].mxu1 }
 0x483   : > { %v673_v11 = vpop.f32.mrb[5].mxu1  ;;  %v688_v15 = vpack.c.bf16 %v1267_v9, %v1267_v9 }
 0x484   : > { %v1268_v12 = vpop.f32.mrb[6].mxu1 }
 0x485   : > { %v676_v13 = vpop.f32.mrb[7].mxu1 }
 0x486   : > { %v687_v14 = vpack.c.bf16 %v676_v13, %v673_v11 }
 0x488   : > { %825 = vmatmul.mubr.bf16.vlgmr.msra.gmra.mrb[8].mxu1 %v687_v14 }
 0x489   : > { %832 = vmatprep.mubr.bf16.mxu1 %v1924_v10 }
 0x490   : > { %833 = vmatmul.mubr.bf16.gmra.mrb[12].mxu1 %v688_v15 }
 0x55b   : > { %v1215_v10 = vpop.f32.mrb[8].mxu1 }
 0x55c   : > { %v1216_v23 = vpop.f32.mrb[9].mxu1 }
 0x55d   : > { %v1217_v24 = vadd.f32 %v1216_v23, %v1215_v10  ;;  %v1218_v25 = vpop.f32.mrb[10].mxu1 }
 0x55e   : > { %v1219_v26 = vpop.f32.mrb[11].mxu1 }
 0x55f   : > { %v827_v27 = vadd.f32 %v1217_v24, %v1143_v22  ;;  %v1220_v28 = vadd.f32 %v1219_v26, %v1218_v25 }
 0x561   : > { %v830_v29 = vadd.f32 %v1220_v28, %v1143_v22  ;;  %1416 = vtanh.f32 %v827_v27 }
 0x563   : > { %1418 = vtanh.f32 %v830_v29  ;;  %v1221_v30 = vpop.f32.mrb[12].mxu1 }
 0x564   : > { %v1222_v31 = vpop.f32.mrb[13].mxu1 }
 0x565   : > { %v1223_v32 = vadd.f32 %v1222_v31, %v1221_v30  ;;  %v1224_v33 = vpop.f32.mrb[14].mxu1 }
 0x566   : > { %v1225_v34 = vpop.f32.mrb[15].mxu1 }
 0x567   : > { %v835_v35 = vadd.f32 %v1223_v32, %v1143_v22 }
 0x569   : > { %1420 = vtanh.f32 %v835_v35 }
 0x56b   : > { %v1417_v36 = vpop.eup %1416 }
 0x56d   : > { %v1419_v37 = vpop.eup %1418 }
 0x56e   : > { %v843_v38 = vpack.c.bf16 %v1419_v37, %v1417_v36 }
 0x570   : > { %1285 = vmatprep.mubr.bf16.mxu0 %v843_v38 }
 0x573   : > { %v1421_v39 = vpop.eup %1420 }
 0x574   : > { %v844_v40 = vpack.c.bf16 %v1421_v39, %v1421_v39 }
 0x576   : > { %1286 = vmatmul.mubr.bf16.vlgmr.msra.gmra.mrb[4].mxu0 %v844_v40 }
 0x649   : > { %v1287_v42 = vpop.f32.mrb[4].mxu0 }
 0x64a   : > { %v959_v43 = vadd.f32 %v1287_v42, %v1160_v41  ;;  %v950_v44 = vpop.f32.mrb[5].mxu0 }
 0x64b   : > { %v1288_v45 = vpop.f32.mrb[6].mxu0  ;;  %v951_v48 = vadd.f32 %v1160_v41, %v950_v44 }
 0x64c   : > { %v1177_v46 = vpack.c.bf16 %v959_v43, %v959_v43  ;;  %v953_v47 = vpop.f32.mrb[7].mxu0 }
 0x64d   : > { %v954_v49 = vadd.f32 %v1160_v41, %v953_v47 }
 0x64e   : > { %979 = vst [vmem:[%s373_s3 + $0x8] sm:$0xf] %v1177_v46 }
 0x64f   : > { %v1181_v50 = vpack.c.bf16 %v954_v49, %v951_v48 }
 0x651   : > { %1182 = vst [vmem:[%s373_s3] sm:$0xff] %v1181_v50  }
 0x652   : > { %1551 = shalt.err (!%p1548_p9)
}
 0x653   : > { %s1552_s15 = scalar_lea.hbm %s1958_s13, 192  ;;  %s1556_s14 = scalar_lea.hbm %s2009_s7, 384 }
 0x654   : > { %p1553_p0 = scmp.ne.s32.totalorder %s1958_s13, %s1552_s15  ;;  %p1557_p2 = scmp.lt.u32.totalorder %s1958_s13, %s2009_s7 }
 0x655   : > { %p1558_p12 = scmp.lt.u32.totalorder %s1556_s14, %s1552_s15  ;;  %p1560_p13 = scmp.lt.u32.totalorder %s1552_s15, %s1958_s13 }
 0x656   : > { %p1554_p8 = pnand %p1553_p0, %p2036_p6 }
 0x657   : > { %p1559_p1 = por %p1558_p12, %p1557_p2 }
 0x658   : > { %p1555_p11 = pneg %p1554_p8 }
 0x659   : > { %p1561_p10 = por %p1560_p13, %p1559_p1 }
 0x65b   : > { %p1562_p4 = pnand %p1561_p10, %p1555_p11 }
 0x65d   : > { %1565 = shalt.err (!%p1562_p4)
}
 0x65e   : > { %s1625_s3 = smov 64   ;;  %s1626_s11 = smov 4  }
 0x65f   : > { %1306 = dma.vmem_to_hbm [thread:$0]  (%p2036_p6), %s1953_s18, 192, %s1958_s13, %s981_s9, %s1625_s3, %s1625_s3, %s1626_s11  }
 0x660 PF: > { %s1009_s10 = sand.u32 1, %s1604_s24   ;;  %p2037_p5 = scmp.ne.s32.totalorder %s2019_s8, 0 }
 0x661   : > { %p2038_p3 = scmp.ge.s32.totalorder %s1616_s27, 2  ;;  %s1010_s0 = scalar_lea.sflag [#allocation4], %s1009_s10 }
 0x663   : > { %p1323_p7 = pnand %p2038_p3, %p2037_p5 }
 0x665   : > { %1599 = dma.done.wait (!%p1323_p7), %s1010_s0, 192  }
 0x666   : > { %1601 = vsyncadd (!%p1323_p7), %s1010_s0, 4294967104  ;;  %p24_p9 = scmp.ge.s32.totalorder %s1783_s12, 4   ;;  %s2039_s24 = smov %s1608_s25 }
 0x667   : > { %s2040_s25 = smov %s1612_s26  ;;  %s2041_s26 = smov %s1799_s17 }
 0x668   : > { %s2042_s27 = smov %s1783_s12  ;;  %26 = sbr.rel (!%p24_p9) target bundleno = 12 (0xc), region = 117 }
 0x66f   :  { %1015 = vsyncpa [#allocation3], 1 }
 0x670   :  { %1017 = vsyncpa [#allocation3 + $0x1], 1 }
 0x671   :  { %1018 = vsyncpa [#allocation6], 1 }
 0x672   :  { %1020 = vsyncpa [#allocation6 + $0x1], 1 }
 0x673   :  { %1021 = vsyncpa [#allocation9], 1 }
 0x674   :  { %1022 = vsyncpa [#allocation4], 1 }
 0x675   :  { %1024 = vsyncpa [#allocation4 + $0x1], 1 }

</bundles_post_ra>
